<compile_context>
chip_gen: v7x
topology: tpu7x:2x2x1
jax: 0.10.0
libtpu: 0.0.40
codegen_flags: <defaults>
</compile_context>

<pallas_src>
import functools
import math

import jax
import jax.numpy as jnp
import numpy as np
from jax import lax
from jax.experimental import pallas as pl
from jax.experimental.pallas import tpu as pltpu
from jax.scipy.linalg import block_diag


# ----------------------------------------------------------------------------
# Pallas kernel: fused ensemble MLP forward + manual backward + reductions
# ----------------------------------------------------------------------------
def _ensemble_bias_kernel(t2_ref, slab_ref, outg_ref, oute_ref, *,
                          n_models, n_feat, e0, e1):
    f32 = jnp.float32
    M, F = n_models, n_feat
    W = M * F                      # packed hidden width (lane dimension)
    twoC = t2_ref.shape[1]
    C = twoC // 2

    # ---- static slab row offsets (must match pack_params layout) -----------
    r_w1 = 3 * W
    r_b = r_w1 + twoC
    w2 = slab_ref[0:W, :]
    w3 = slab_ref[W:2 * W, :]
    w4 = slab_ref[2 * W:3 * W, :]
    w1 = slab_ref[r_w1:r_w1 + twoC, :]
    b1 = slab_ref[r_b + 0:r_b + 1, :]
    b2 = slab_ref[r_b + 1:r_b + 2, :]
    b3 = slab_ref[r_b + 2:r_b + 3, :]
    b4 = slab_ref[r_b + 3:r_b + 4, :]
    w5f = slab_ref[r_b + 4:r_b + 5, :].astype(f32)     # (1, W) last-layer weights
    b5 = slab_ref[r_b + 5:r_b + 6, :].astype(f32)      # (1, W) b5 zero-padded
    wdt = slab_ref.dtype                               # f32 or bf16 weight storage

    def mm(a, b):        # lane-dense matmul, f32 accumulation on the MXU
        return jnp.dot(a.astype(wdt), b, preferred_element_type=f32)

    def mm_t(a, b):      # a @ b.T without a materialized transposed weight copy
        return lax.dot_general(a.astype(wdt), b, (((1,), (1,)), ((), ())),
                               preferred_element_type=f32)

    # ---- shared featurization: x = [cos t, sin t], fac = [-sin t, cos t] ----
    t2 = t2_ref[...].astype(f32)                       # (1, 2C): torsion duplicated
    lane = lax.broadcasted_iota(jnp.int32, (1, twoC), 1)
    is_cos = lane < C
    ct, st = jnp.cos(t2), jnp.sin(t2)
    x = jnp.where(is_cos, ct, st)                      # (1, 2C) layer-1 input
    fac = jnp.where(is_cos, -st, ct)                   # (1, 2C) d[cos,sin]/dt factor

    # ---- forward: one lane-dense matmul per layer ---------------------------
    z1 = mm(x, w1) + b1                                # (1, W)
    h1 = jnp.maximum(z1, 0.0)
    z2 = mm(h1, w2) + b2
    h2 = jnp.maximum(z2, 0.0)
    z3 = mm(h2, w3) + b3
    h3 = jnp.maximum(z3, 0.0)
    z4 = mm(h3, w4) + b4
    h4 = jnp.maximum(z4, 0.0)
    # mean energy without an MXU matmul: VPU multiply + lane reduction
    e_ave = (jnp.sum(h4 * w5f, axis=1, keepdims=True)
             + jnp.sum(b5, axis=1, keepdims=True)) / M          # (1, 1)

    # ---- manual backward (dE_m / d torsion); block-diagonal weights keep the
    #      per-model blocks separated along lanes the whole way down ----------
    g4 = jnp.where(z4 > 0, w5f, 0.0)                            # (1, W)
    g3 = jnp.where(z3 > 0, mm_t(g4, w4), 0.0)
    g2 = jnp.where(z2 > 0, mm_t(g3, w3), 0.0)
    g1 = jnp.where(z1 > 0, mm_t(g2, w2), 0.0)                   # (1, W)

    # scatter the flat layer-1 gradient into per-model rows (mask from iotas)
    col = lax.broadcasted_iota(jnp.int32, (M, W), 1)
    row = lax.broadcasted_iota(jnp.int32, (M, W), 0)
    in_block = (col >= row * F) & (col < row * F + F)
    g1_rows = jnp.where(in_block, g1, 0.0)                      # (M, W)

    gx = mm_t(g1_rows, w1)                                      # (M, 2C)
    gp = gx * fac                                               # chain through cos/sin
    grads = gp[:, :C] + gp[:, C:]                               # (M, C) dE_m/dt

    # ---- fused ensemble reductions + uncertainty switch ---------------------
    mean_g = jnp.mean(grads, axis=0, keepdims=True)             # (1, C)
    diff = grads - mean_g
    var = jnp.sum(diff * diff, axis=0, keepdims=True) / (M - 1.0)   # ddof=1
    model_div = jnp.sqrt(jnp.sum(var, axis=1, keepdims=True) / C)   # (1, 1)
    iswitch = (e1 - model_div) / (e1 - e0)
    smooth = 0.5 * (1.0 + jnp.cos(jnp.pi * (1.0 - iswitch)))
    fl = jnp.floor(iswitch)
    sigma = jnp.where(fl > 0, 1.0, jnp.where(fl < 0, 0.0, smooth))  # heaviside

    # ---- single full-block store per output (no zero-fill / sub-lane stores)
    outg_ref[...] = (mean_g * sigma).astype(outg_ref.dtype)     # (1, C)
    oute_ref[...] = (e_ave * sigma).astype(oute_ref.dtype)      # (1, 1)


def _ensemble_bias_call(torsion, slab, *, n_models, n_feat, e0, e1):
    """Run the fused kernel; returns (sigma*d(mean E)/dt (C,), sigma*mean E ())."""
    C = torsion.shape[0]
    t2 = jnp.concatenate([torsion, torsion]).reshape(1, 2 * C).astype(jnp.float32)
    vmem = pl.BlockSpec(memory_space=pltpu.MemorySpace.VMEM)
    kernel = functools.partial(_ensemble_bias_kernel, n_models=n_models,
                               n_feat=n_feat, e0=float(e0), e1=float(e1))
    out_g, out_e = pl.pallas_call(
        kernel,
        out_shape=(jax.ShapeDtypeStruct((1, C), jnp.float32),
                   jax.ShapeDtypeStruct((1, 1), jnp.float32)),
        in_specs=[vmem, vmem],          # whole operands resident in VMEM, no grid
        out_specs=(vmem, vmem),
    )(t2, slab)
    return out_g[0], out_e[0, 0]


# ----------------------------------------------------------------------------
# Weight repacking: per-model params -> one block-diagonal slab (single DMA)
# ----------------------------------------------------------------------------
def pack_params(params, weight_dtype=jnp.float32):
    w1 = params["w1"]                    # (M, 2C, F)
    M, twoC, F = w1.shape
    for name in ("w2", "w3", "w4"):
        assert params[name].shape == (M, F, F), "slab layout needs equal feature widths"
    assert params["w5"].shape == (M, F, 1)
    W = M * F

    def bdiag(w):                        # (M, F, F) -> (M*F, M*F) block-diagonal
        return block_diag(*[w[m] for m in range(M)])

    rows = [
        bdiag(params["w2"]),                                   # rows [0, W)
        bdiag(params["w3"]),                                   # rows [W, 2W)
        bdiag(params["w4"]),                                   # rows [2W, 3W)
        jnp.transpose(w1, (1, 0, 2)).reshape(twoC, W),         # layer-1, stacked lanes
        params["b1"].reshape(1, W), params["b2"].reshape(1, W),
        params["b3"].reshape(1, W), params["b4"].reshape(1, W),
        params["w5"].reshape(1, W),                            # flat last-layer weights
        jnp.pad(params["b5"].reshape(1, M), ((0, 0), (0, W - M))),
    ]
    slab = jnp.concatenate(rows, axis=0).astype(weight_dtype)
    pad = (-slab.shape[0]) % 8
    if pad:
        slab = jnp.pad(slab, ((0, pad), (0, 0)))
    return slab


# ----------------------------------------------------------------------------
# Glue: dihedral collective variable, PBC wrap, chain rule to particle forces
# ----------------------------------------------------------------------------
def dihedral_angles(p4):
    """p4: (C, 4, 3) -> (C,) dihedral angles (standard colvar_fn)."""
    p0, p1, p2, p3 = p4[:, 0], p4[:, 1], p4[:, 2], p4[:, 3]
    b0 = p0 - p1
    b1 = p2 - p1
    b2 = p3 - p2
    b1n = b1 / jnp.linalg.norm(b1, axis=-1, keepdims=True)
    v = b0 - jnp.sum(b0 * b1n, -1, keepdims=True) * b1n
    w = b2 - jnp.sum(b2 * b1n, -1, keepdims=True) * b1n
    x = jnp.sum(v * w, -1)
    y = jnp.sum(jnp.cross(b1n, v) * w, -1)
    return jnp.arctan2(y, x)


def _wrap_and_dihedrals(positions, boxvectors, colvar_idx):
    boxsize = jnp.diag(boxvectors)
    wrapped = positions - jnp.floor(positions / boxsize) * boxsize  # floor: zero grad
    sel = wrapped[colvar_idx.reshape(-1)].reshape(-1, 4, 3)
    return dihedral_angles(sel)


def dihedral_bias_forward(positions, boxvectors, colvar_idx, slab, *,
                          n_models, n_feat, e0=2.0, e1=3.0):
    """Mirrors DihedralBiasVMap2.forward: returns (energy_ave*sigma, forces*sigma)."""
    torsion, vjp_fn = jax.vjp(
        lambda pos: _wrap_and_dihedrals(pos, boxvectors, colvar_idx), positions)
    scaled_cot, scaled_energy = _ensemble_bias_call(
        torsion, slab, n_models=n_models, n_feat=n_feat, e0=e0, e1=e1)
    (scaled_forces,) = vjp_fn(scaled_cot)   # vjp is linear => already scaled by sigma
    return scaled_energy, scaled_forces


# ----------------------------------------------------------------------------
# Pure-JAX reference (per-model einsum ensemble + jacrev) for validation
# ----------------------------------------------------------------------------
def reference_forward(positions, boxvectors, colvar_idx, params, e0=2.0, e1=3.0):
    hp = jax.lax.Precision.HIGHEST

    def energies(torsion):
        x = jnp.concatenate([jnp.cos(torsion), jnp.sin(torsion)], axis=-1)[None, :]
        h = jnp.einsum("ij,mjk->mik", x, params["w1"], precision=hp) + params["b1"]
        h = jnp.maximum(h, 0.0)
        for name in ("w2", "w3", "w4"):
            h = jnp.einsum("mij,mjk->mik", h, params[name], precision=hp) \
                + params["b" + name[1]]
            h = jnp.maximum(h, 0.0)
        eo = jnp.einsum("mij,mjk->mik", h, params["w5"], precision=hp) + params["b5"]
        return eo[:, 0, 0]                                   # (M,)

    torsion, vjp_fn = jax.vjp(
        lambda pos: _wrap_and_dihedrals(pos, boxvectors, colvar_idx), positions)
    energy = energies(torsion)
    grads = jax.jacrev(energies)(torsion)                    # (M, C)
    energy_ave = jnp.mean(energy)
    (forces,) = vjp_fn(jnp.mean(grads, axis=0))
    model_div = jnp.sqrt(jnp.mean(jnp.var(grads, axis=0, ddof=1)))
    iswitch = (e1 - model_div) / (e1 - e0)
    smooth = 0.5 * (1.0 + jnp.cos(jnp.pi * (1.0 - iswitch)))
    fl = jnp.floor(iswitch)
    sigma = jnp.where(fl > 0, 1.0, jnp.where(fl < 0, 0.0, smooth))
    return energy_ave * sigma, forces * sigma


# ----------------------------------------------------------------------------
# Deterministic parameter init (shapes from MultiLinearLayer.__init__)
# ----------------------------------------------------------------------------
def init_params(key, n_models, n_cvs, features):
    dims = [2 * n_cvs] + list(features) + [1]
    params = {}
    for li in range(len(dims) - 1):
        key, kw, kb = jax.random.split(key, 3)
        din, dout = dims[li], dims[li + 1]
        bound = 1.0 / math.sqrt(din)
        params[f"w{li+1}"] = jax.random.uniform(
            kw, (n_models, din, dout), jnp.float32, -bound, bound)
        params[f"b{li+1}"] = jax.random.uniform(
            kb, (n_models, 1, dout), jnp.float32, -bound, bound)
    return params


if __name__ == "__main__":
    key = jax.random.PRNGKey(0)
    n_models, n_cvs = 4, 8
    features = [32, 32, 32, 32]          # M*F = 128 -> one full MXU tile per layer
    n_particles = 16

    k_params, k_pos = jax.random.split(key)
    params = init_params(k_params, n_models, n_cvs, features)
    slab_f32 = pack_params(params)                        # exact module numerics
    slab_bf16 = pack_params(params, jnp.bfloat16)         # halved weight DMA bytes

    positions = jax.random.normal(k_pos, (n_particles, 3), jnp.float32) * 1.5 + 5.0
    boxvectors = jnp.eye(3, dtype=jnp.float32) * 10.0
    base = jnp.arange(n_cvs, dtype=jnp.int32)
    colvar_idx = jnp.stack([base, base + 1, base + 2, base + 3], axis=1)  # (n_cvs, 4)

    fwd = jax.jit(functools.partial(dihedral_bias_forward,
                                    n_models=n_models, n_feat=features[0]))

    # ---- f32 weights: matches the PyTorch module's numerics ----------------
    energy, forces = fwd(positions, boxvectors, colvar_idx, slab_f32)
    jax.block_until_ready((energy, forces))
    assert energy.shape == ()
    assert forces.shape == (n_particles, 3)
    assert bool(jnp.isfinite(energy)) and bool(jnp.all(jnp.isfinite(forces)))

    ref_e, ref_f = jax.jit(reference_forward)(positions, boxvectors, colvar_idx, params)
    np.testing.assert_allclose(np.asarray(energy), np.asarray(ref_e),
                               rtol=2e-2, atol=2e-3)
    np.testing.assert_allclose(np.asarray(forces), np.asarray(ref_f),
                               rtol=2e-2, atol=2e-3)

    # ---- bf16-stored weights: perf path (half the HBM->VMEM weight bytes);
    #      loose tolerance: bf16 rounding can flip ReLU masks near z == 0.
    energy_bf, forces_bf = fwd(positions, boxvectors, colvar_idx, slab_bf16)
    jax.block_until_ready((energy_bf, forces_bf))
    assert bool(jnp.isfinite(energy_bf)) and bool(jnp.all(jnp.isfinite(forces_bf)))
    np.testing.assert_allclose(np.asarray(energy_bf), np.asarray(energy),
                               rtol=0.25, atol=0.05)
    np.testing.assert_allclose(np.asarray(forces_bf), np.asarray(forces),
                               rtol=0.25, atol=0.05)

    print("KERNEL_OK")
</pallas_src>

<mosaic_0001>
module attributes {stable_mosaic.version = 11 : i64} {
  func.func @_ensemble_bias_kernel(%arg0: memref<1x16xf32, #tpu.memory_space<vmem>>, %arg1: memref<408x128xf32, #tpu.memory_space<vmem>>, %arg2: memref<1x8xf32, #tpu.memory_space<vmem>>, %arg3: memref<1x1xf32, #tpu.memory_space<vmem>>) attributes {dimension_semantics = [], scalar_prefetch = 0 : i64, scratch_operands = 0 : i64, tpu.core_type = #tpu.core_type<tc>} {
    %c0 = arith.constant 0 : index
    %c0_0 = arith.constant 0 : index
    %0 = vector.load %arg1[%c0, %c0_0] : memref<408x128xf32, #tpu.memory_space<vmem>>, vector<128x128xf32>
    %c128 = arith.constant 128 : index
    %c0_1 = arith.constant 0 : index
    %1 = vector.load %arg1[%c128, %c0_1] : memref<408x128xf32, #tpu.memory_space<vmem>>, vector<128x128xf32>
    %c256 = arith.constant 256 : index
    %c0_2 = arith.constant 0 : index
    %2 = vector.load %arg1[%c256, %c0_2] : memref<408x128xf32, #tpu.memory_space<vmem>>, vector<128x128xf32>
    %c384 = arith.constant 384 : index
    %c0_3 = arith.constant 0 : index
    %3 = vector.load %arg1[%c384, %c0_3] : memref<408x128xf32, #tpu.memory_space<vmem>>, vector<16x128xf32>
    %c400 = arith.constant 400 : index
    %c0_4 = arith.constant 0 : index
    %4 = vector.load %arg1[%c400, %c0_4] : memref<408x128xf32, #tpu.memory_space<vmem>>, vector<1x128xf32>
    %c401 = arith.constant 401 : index
    %c0_5 = arith.constant 0 : index
    %5 = vector.load %arg1[%c401, %c0_5] : memref<408x128xf32, #tpu.memory_space<vmem>>, vector<1x128xf32>
    %c402 = arith.constant 402 : index
    %c0_6 = arith.constant 0 : index
    %6 = vector.load %arg1[%c402, %c0_6] : memref<408x128xf32, #tpu.memory_space<vmem>>, vector<1x128xf32>
    %c403 = arith.constant 403 : index
    %c0_7 = arith.constant 0 : index
    %7 = vector.load %arg1[%c403, %c0_7] : memref<408x128xf32, #tpu.memory_space<vmem>>, vector<1x128xf32>
    %c404 = arith.constant 404 : index
    %c0_8 = arith.constant 0 : index
    %8 = vector.load %arg1[%c404, %c0_8] : memref<408x128xf32, #tpu.memory_space<vmem>>, vector<1x128xf32>
    %c405 = arith.constant 405 : index
    %c0_9 = arith.constant 0 : index
    %9 = vector.load %arg1[%c405, %c0_9] : memref<408x128xf32, #tpu.memory_space<vmem>>, vector<1x128xf32>
    %c0_10 = arith.constant 0 : index
    %c0_11 = arith.constant 0 : index
    %10 = vector.load %arg0[%c0_10, %c0_11] : memref<1x16xf32, #tpu.memory_space<vmem>>, vector<1x16xf32>
    %11 = tpu.iota {dimensions = array<i32: 1>} : vector<1x16xi32>
    %c8_i32 = arith.constant 8 : i32
    %12 = vector.broadcast %c8_i32 : i32 to vector<1x16xi32>
    %13 = arith.cmpi slt, %11, %12 : vector<1x16xi32>
    %14 = math.cos %10 : vector<1x16xf32>
    %15 = math.sin %10 : vector<1x16xf32>
    %16 = arith.select %13, %14, %15 : vector<1x16xi1>, vector<1x16xf32>
    %cst = arith.constant 0.000000e+00 : f32
    %17 = vector.broadcast %cst : f32 to vector<1x16xf32>
    %18 = arith.subf %17, %15 : vector<1x16xf32>
    %19 = arith.select %13, %18, %14 : vector<1x16xi1>, vector<1x16xf32>
    %cst_12 = arith.constant dense<0.000000e+00> : vector<1x128xf32>
    %20 = tpu.matmul %16, %3, %cst_12 {dimension_numbers = #tpu.dot_dimension_numbers<[1], [0], [0], [1], [0, 0, 1, 1], [], []>} : vector<1x16xf32>, vector<16x128xf32>, vector<1x128xf32> -> vector<1x128xf32>
    %21 = arith.addf %20, %4 : vector<1x128xf32>
    %cst_13 = arith.constant 0.000000e+00 : f32
    %22 = vector.broadcast %cst_13 : f32 to vector<1x128xf32>
    %23 = arith.maximumf %21, %22 : vector<1x128xf32>
    %cst_14 = arith.constant dense<0.000000e+00> : vector<1x128xf32>
    %24 = tpu.matmul %23, %0, %cst_14 {dimension_numbers = #tpu.dot_dimension_numbers<[1], [0], [0], [1], [0, 0, 1, 1], [], []>} : vector<1x128xf32>, vector<128x128xf32>, vector<1x128xf32> -> vector<1x128xf32>
    %25 = arith.addf %24, %5 : vector<1x128xf32>
    %cst_15 = arith.constant 0.000000e+00 : f32
    %26 = vector.broadcast %cst_15 : f32 to vector<1x128xf32>
    %27 = arith.maximumf %25, %26 : vector<1x128xf32>
    %cst_16 = arith.constant dense<0.000000e+00> : vector<1x128xf32>
    %28 = tpu.matmul %27, %1, %cst_16 {dimension_numbers = #tpu.dot_dimension_numbers<[1], [0], [0], [1], [0, 0, 1, 1], [], []>} : vector<1x128xf32>, vector<128x128xf32>, vector<1x128xf32> -> vector<1x128xf32>
    %29 = arith.addf %28, %6 : vector<1x128xf32>
    %cst_17 = arith.constant 0.000000e+00 : f32
    %30 = vector.broadcast %cst_17 : f32 to vector<1x128xf32>
    %31 = arith.maximumf %29, %30 : vector<1x128xf32>
    %cst_18 = arith.constant dense<0.000000e+00> : vector<1x128xf32>
    %32 = tpu.matmul %31, %2, %cst_18 {dimension_numbers = #tpu.dot_dimension_numbers<[1], [0], [0], [1], [0, 0, 1, 1], [], []>} : vector<1x128xf32>, vector<128x128xf32>, vector<1x128xf32> -> vector<1x128xf32>
    %33 = arith.addf %32, %7 : vector<1x128xf32>
    %cst_19 = arith.constant 0.000000e+00 : f32
    %34 = vector.broadcast %cst_19 : f32 to vector<1x128xf32>
    %35 = arith.maximumf %33, %34 : vector<1x128xf32>
    %36 = arith.mulf %35, %8 : vector<1x128xf32>
    %cst_20 = arith.constant dense<0.000000e+00> : vector<1xf32>
    %37 = vector.multi_reduction <add>, %36, %cst_20 [1] : vector<1x128xf32> to vector<1xf32>
    %38 = vector.shape_cast %37 : vector<1xf32> to vector<1x1xf32>
    %cst_21 = arith.constant dense<0.000000e+00> : vector<1xf32>
    %39 = vector.multi_reduction <add>, %9, %cst_21 [1] : vector<1x128xf32> to vector<1xf32>
    %40 = vector.shape_cast %39 : vector<1xf32> to vector<1x1xf32>
    %41 = arith.addf %38, %40 : vector<1x1xf32>
    %cst_22 = arith.constant 4.000000e+00 : f32
    %42 = vector.broadcast %cst_22 : f32 to vector<1x1xf32>
    %43 = arith.divf %41, %42 : vector<1x1xf32>
    %cst_23 = arith.constant 0.000000e+00 : f32
    %44 = vector.broadcast %cst_23 : f32 to vector<1x128xf32>
    %45 = arith.cmpf ogt, %33, %44 : vector<1x128xf32>
    %cst_24 = arith.constant 0.000000e+00 : f32
    %46 = vector.broadcast %cst_24 : f32 to vector<1x128xf32>
    %47 = arith.select %45, %8, %46 : vector<1x128xi1>, vector<1x128xf32>
    %cst_25 = arith.constant 0.000000e+00 : f32
    %48 = vector.broadcast %cst_25 : f32 to vector<1x128xf32>
    %49 = arith.cmpf ogt, %29, %48 : vector<1x128xf32>
    %cst_26 = arith.constant dense<0.000000e+00> : vector<1x128xf32>
    %50 = tpu.matmul %47, %2, %cst_26 {dimension_numbers = #tpu.dot_dimension_numbers<[1], [1], [0], [0], [0, 0, 1, 0], [], []>} : vector<1x128xf32>, vector<128x128xf32>, vector<1x128xf32> -> vector<1x128xf32>
    %cst_27 = arith.constant 0.000000e+00 : f32
    %51 = vector.broadcast %cst_27 : f32 to vector<1x128xf32>
    %52 = arith.select %49, %50, %51 : vector<1x128xi1>, vector<1x128xf32>
    %cst_28 = arith.constant 0.000000e+00 : f32
    %53 = vector.broadcast %cst_28 : f32 to vector<1x128xf32>
    %54 = arith.cmpf ogt, %25, %53 : vector<1x128xf32>
    %cst_29 = arith.constant dense<0.000000e+00> : vector<1x128xf32>
    %55 = tpu.matmul %52, %1, %cst_29 {dimension_numbers = #tpu.dot_dimension_numbers<[1], [1], [0], [0], [0, 0, 1, 0], [], []>} : vector<1x128xf32>, vector<128x128xf32>, vector<1x128xf32> -> vector<1x128xf32>
    %cst_30 = arith.constant 0.000000e+00 : f32
    %56 = vector.broadcast %cst_30 : f32 to vector<1x128xf32>
    %57 = arith.select %54, %55, %56 : vector<1x128xi1>, vector<1x128xf32>
    %cst_31 = arith.constant 0.000000e+00 : f32
    %58 = vector.broadcast %cst_31 : f32 to vector<1x128xf32>
    %59 = arith.cmpf ogt, %21, %58 : vector<1x128xf32>
    %cst_32 = arith.constant dense<0.000000e+00> : vector<1x128xf32>
    %60 = tpu.matmul %57, %0, %cst_32 {dimension_numbers = #tpu.dot_dimension_numbers<[1], [1], [0], [0], [0, 0, 1, 0], [], []>} : vector<1x128xf32>, vector<128x128xf32>, vector<1x128xf32> -> vector<1x128xf32>
    %cst_33 = arith.constant 0.000000e+00 : f32
    %61 = vector.broadcast %cst_33 : f32 to vector<1x128xf32>
    %62 = arith.select %59, %60, %61 : vector<1x128xi1>, vector<1x128xf32>
    %63 = tpu.iota {dimensions = array<i32: 1>} : vector<4x128xi32>
    %64 = tpu.iota {dimensions = array<i32: 0>} : vector<4x128xi32>
    %c32_i32 = arith.constant 32 : i32
    %65 = vector.broadcast %c32_i32 : i32 to vector<4x128xi32>
    %66 = arith.muli %64, %65 : vector<4x128xi32>
    %67 = arith.cmpi sge, %63, %66 : vector<4x128xi32>
    %c32_i32_34 = arith.constant 32 : i32
    %68 = vector.broadcast %c32_i32_34 : i32 to vector<4x128xi32>
    %69 = arith.muli %64, %68 : vector<4x128xi32>
    %c32_i32_35 = arith.constant 32 : i32
    %70 = vector.broadcast %c32_i32_35 : i32 to vector<4x128xi32>
    %71 = arith.addi %69, %70 : vector<4x128xi32>
    %72 = arith.cmpi slt, %63, %71 : vector<4x128xi32>
    %73 = arith.andi %67, %72 : vector<4x128xi1>
    %cst_36 = arith.constant 0.000000e+00 : f32
    %74 = vector.shape_cast %62 : vector<1x128xf32> to vector<1x128xf32>
    %75 = vector.broadcast %74 : vector<1x128xf32> to vector<4x128xf32>
    %76 = vector.broadcast %cst_36 : f32 to vector<4x128xf32>
    %77 = arith.select %73, %75, %76 : vector<4x128xi1>, vector<4x128xf32>
    %cst_37 = arith.constant dense<0.000000e+00> : vector<4x16xf32>
    %78 = tpu.matmul %77, %3, %cst_37 {dimension_numbers = #tpu.dot_dimension_numbers<[1], [1], [0], [0], [0, 0, 1, 0], [], []>} : vector<4x128xf32>, vector<16x128xf32>, vector<4x16xf32> -> vector<4x16xf32>
    %79 = vector.broadcast %19 : vector<1x16xf32> to vector<4x16xf32>
    %80 = arith.mulf %78, %79 : vector<4x16xf32>
    %81 = vector.extract_strided_slice %80 {offsets = [0, 0], sizes = [4, 8], strides = [1, 1]} : vector<4x16xf32> to vector<4x8xf32>
    %82 = vector.extract_strided_slice %80 {offsets = [0, 8], sizes = [4, 8], strides = [1, 1]} : vector<4x16xf32> to vector<4x8xf32>
    %83 = arith.addf %81, %82 : vector<4x8xf32>
    %cst_38 = arith.constant dense<0.000000e+00> : vector<8xf32>
    %84 = vector.multi_reduction <add>, %83, %cst_38 [0] : vector<4x8xf32> to vector<8xf32>
    %85 = vector.shape_cast %84 : vector<8xf32> to vector<1x8xf32>
    %cst_39 = arith.constant 4.000000e+00 : f32
    %86 = vector.broadcast %cst_39 : f32 to vector<1x8xf32>
    %87 = arith.divf %85, %86 : vector<1x8xf32>
    %88 = vector.broadcast %87 : vector<1x8xf32> to vector<4x8xf32>
    %89 = arith.subf %83, %88 : vector<4x8xf32>
    %90 = arith.mulf %89, %89 : vector<4x8xf32>
    %cst_40 = arith.constant dense<0.000000e+00> : vector<8xf32>
    %91 = vector.multi_reduction <add>, %90, %cst_40 [0] : vector<4x8xf32> to vector<8xf32>
    %92 = vector.shape_cast %91 : vector<8xf32> to vector<1x8xf32>
    %cst_41 = arith.constant 3.000000e+00 : f32
    %93 = vector.broadcast %cst_41 : f32 to vector<1x8xf32>
    %94 = arith.divf %92, %93 : vector<1x8xf32>
    %cst_42 = arith.constant dense<0.000000e+00> : vector<1xf32>
    %95 = vector.multi_reduction <add>, %94, %cst_42 [1] : vector<1x8xf32> to vector<1xf32>
    %96 = vector.shape_cast %95 : vector<1xf32> to vector<1x1xf32>
    %cst_43 = arith.constant 8.000000e+00 : f32
    %97 = vector.broadcast %cst_43 : f32 to vector<1x1xf32>
    %98 = arith.divf %96, %97 : vector<1x1xf32>
    %99 = math.sqrt %98 : vector<1x1xf32>
    %cst_44 = arith.constant 3.000000e+00 : f32
    %100 = vector.broadcast %cst_44 : f32 to vector<1x1xf32>
    %101 = arith.subf %100, %99 : vector<1x1xf32>
    %cst_45 = arith.constant 1.000000e+00 : f32
    %102 = vector.broadcast %cst_45 : f32 to vector<1x1xf32>
    %103 = arith.divf %101, %102 : vector<1x1xf32>
    %cst_46 = arith.constant 1.000000e+00 : f32
    %104 = vector.broadcast %cst_46 : f32 to vector<1x1xf32>
    %105 = arith.subf %104, %103 : vector<1x1xf32>
    %cst_47 = arith.constant 3.14159274 : f32
    %106 = vector.broadcast %cst_47 : f32 to vector<1x1xf32>
    %107 = arith.mulf %106, %105 : vector<1x1xf32>
    %108 = math.cos %107 : vector<1x1xf32>
    %cst_48 = arith.constant 1.000000e+00 : f32
    %109 = vector.broadcast %cst_48 : f32 to vector<1x1xf32>
    %110 = arith.addf %109, %108 : vector<1x1xf32>
    %cst_49 = arith.constant 5.000000e-01 : f32
    %111 = vector.broadcast %cst_49 : f32 to vector<1x1xf32>
    %112 = arith.mulf %111, %110 : vector<1x1xf32>
    %113 = math.floor %103 : vector<1x1xf32>
    %cst_50 = arith.constant 0.000000e+00 : f32
    %114 = vector.broadcast %cst_50 : f32 to vector<1x1xf32>
    %115 = arith.cmpf ogt, %113, %114 : vector<1x1xf32>
    %cst_51 = arith.constant 0.000000e+00 : f32
    %116 = vector.broadcast %cst_51 : f32 to vector<1x1xf32>
    %117 = arith.cmpf olt, %113, %116 : vector<1x1xf32>
    %cst_52 = arith.constant 0.000000e+00 : f32
    %118 = vector.broadcast %cst_52 : f32 to vector<1x1xf32>
    %119 = arith.select %117, %118, %112 : vector<1x1xi1>, vector<1x1xf32>
    %cst_53 = arith.constant 1.000000e+00 : f32
    %120 = vector.broadcast %cst_53 : f32 to vector<1x1xf32>
    %121 = arith.select %115, %120, %119 : vector<1x1xi1>, vector<1x1xf32>
    %122 = vector.broadcast %121 : vector<1x1xf32> to vector<1x8xf32>
    %123 = arith.mulf %87, %122 : vector<1x8xf32>
    %c0_54 = arith.constant 0 : index
    %c0_55 = arith.constant 0 : index
    %124 = vector.load %arg2[%c0_54, %c0_55] : memref<1x8xf32, #tpu.memory_space<vmem>>, vector<1x8xf32>
    tpu.vector_store %arg2[%c0_54, %c0_55], %123 {strides = array<i32>} : memref<1x8xf32, #tpu.memory_space<vmem>>, vector<1x8xf32>,
    %125 = arith.mulf %43, %121 : vector<1x1xf32>
    %c0_56 = arith.constant 0 : index
    %c0_57 = arith.constant 0 : index
    %126 = vector.load %arg3[%c0_56, %c0_57] : memref<1x1xf32, #tpu.memory_space<vmem>>, vector<1x1xf32>
    tpu.vector_store %arg3[%c0_56, %c0_57], %125 {strides = array<i32>} : memref<1x1xf32, #tpu.memory_space<vmem>>, vector<1x1xf32>,
    return
  }
}

</mosaic_0001>

<bundles_post_ra>
// kernel: atan2.1
= control target key start
LH: loop header
LB: loop body
LE: loop exit
PB: predicated region body
PF: predicated region fallthrough
CT: control target
= control target key end

     0   :  { %v57_v31 = vmov 0.0   ;;  %v58_v34 = vmov 0.7853982   ;;  %s96_s0 = inlined_call_operand.vmem [shape: f32[8], index: 0, kind: input, shape index: {}]   ;;  %s97_s1 = inlined_call_operand.vmem [shape: f32[8], index: 1, kind: input, shape index: {}]   ;;  %s98_s2 = inlined_call_operand.vmem [shape: f32[8], index: 2, kind: output, shape index: {}]  }
   0x1   :  { %v3_v0 = vld [vmem:[%s96_s0] sm:$0x1] }
   0x2   :  { %v4_v1 = vld [vmem:[%s97_s1] sm:$0x1]  ;;  %v6_v3 = vand.u32 2147483647, %v3_v0  ;;  %vm40_vm1 = vcmp.ne.f32.partialorder %v3_v0, %v3_v0  ;;  %vm37_vm9 = vcmp.eq.f32.partialorder %v3_v0, 0.0  ;;  %v50_v38 = vand.u32 2147483648, %v3_v0 }
   0x3   :  { %v5_v2 = vand.u32 2147483647, %v4_v1  ;;  %vm39_vm0 = vcmp.ne.f32.partialorder %v4_v1, %v4_v1  ;;  %vm35_vm7 = vcmp.lt.s32.totalorder %v4_v1, 0  ;;  %vm32_vm8 = vcmp.lt.f32.partialorder %v4_v1, 0.0 }
   0x4   :  { %vm80_vm3 = vmor %vm39_vm0, %vm40_vm1  ;;  %vm46_vm5 = vcmp.eq.s32.totalorder %v6_v3, inf  ;;  %v36_v32 = vsel %vm35_vm7, 3.1415927, %v57_v31  ;;  %v44_v35 = vsel %vm32_vm8, 2.3561945, %v58_v34 }
   0x5   :  { %v7_v4 = vmin.f32 %v5_v2, %v6_v3  ;;  %v8_v5 = vmax.f32 %v5_v2, %v6_v3  ;;  %vm29_vm2 = vcmp.gt.f32.partialorder %v6_v3, %v5_v2  ;;  %vm45_vm4 = vcmp.eq.s32.totalorder %v5_v2, inf }
   0x6   :  { %vm84_vm6 = vmand %vm45_vm4, %vm46_vm5 }
   0x7   :  { %55 = vrcp.f32 %v8_v5 }
  0x11   :  { %v56_v8 = vpop.eup %55 }
  0x12   :  { %v10_v9 = vmul.f32 %v56_v8, %v7_v4 }
  0x14   :  { %v11_v10 = vmul.f32 %v10_v9, %v10_v9 }
  0x16   :  { %v12_v11 = vmul.f32 0.002785687, %v11_v10 }
  0x18   :  { %v13_v12 = vadd.f32 -0.015866, %v12_v11 }
  0x1a   :  { %v14_v13 = vmul.f32 %v13_v12, %v11_v10 }
  0x1c   :  { %v15_v14 = vadd.f32 0.04247222, %v14_v13 }
  0x1e   :  { %v16_v15 = vmul.f32 %v15_v14, %v11_v10 }
  0x20   :  { %v17_v16 = vadd.f32 -0.074975304, %v16_v15 }
  0x22   :  { %v18_v17 = vmul.f32 %v17_v16, %v11_v10 }
  0x24   :  { %v19_v18 = vadd.f32 0.1064488, %v18_v17 }
  0x26   :  { %v20_v19 = vmul.f32 %v19_v18, %v11_v10 }
  0x28   :  { %v21_v20 = vadd.f32 -0.14207031, %v20_v19 }
  0x2a   :  { %v22_v21 = vmul.f32 %v21_v20, %v11_v10 }
  0x2c   :  { %v23_v22 = vadd.f32 0.19993454, %v22_v21 }
  0x2e   :  { %v24_v23 = vmul.f32 %v23_v22, %v11_v10 }
  0x30   :  { %v25_v24 = vadd.f32 -0.33333147, %v24_v23 }
  0x32   :  { %v26_v25 = vmul.f32 %v25_v24, %v11_v10 }
  0x34   :  { %v27_v26 = vmul.f32 %v26_v25, %v10_v9 }
  0x36   :  { %v28_v27 = vadd.f32 %v27_v26, %v10_v9 }
  0x38   :  { %v30_v28 = vsub.f32 1.5707964, %v28_v27 }
  0x3a   :  { %v31_v29 = vsel %vm29_vm2, %v30_v28, %v28_v27 }
  0x3b   :  { %v33_v30 = vsub.f32 3.1415927, %v31_v29 }
  0x3d   :  { %v34_v33 = vsel %vm32_vm8, %v33_v30, %v31_v29 }
  0x3e   :  { %v38_v36 = vsel %vm37_vm9, %v36_v32, %v34_v33 }
  0x3f   :  { %v42_v37 = vsel %vm80_vm3, nan, %v38_v36 }
  0x40   :  { %v48_v39 = vsel %vm84_vm6, %v44_v35, %v42_v37 }
  0x41   :  { %v49_v40 = vand.u32 2147483647, %v48_v39 }
  0x43   :  { %v51_v41 = vor.u32 %v50_v38, %v49_v40 }
  0x45   :  { %52 = vst [vmem:[%s98_s2] sm:$0x1] %v51_v41 }

// kernel: dihedral_bias_forward.1
= control target key start
LH: loop header
LB: loop body
LE: loop exit
PB: predicated region body
PF: predicated region fallthrough
CT: control target
= control target key end

     0   :  { %v1615_v2 = vmov 0.0|0.0   ;;  %vm1616_vm0 = vmmov 0   ;;  %v1617_v4 = vmov 0.0   ;;  %s2068_s0 = inlined_call_operand.vmem [shape: f32[1,16], index: 0, kind: input, shape index: {}]   ;;  %s2069_s1 = inlined_call_operand.vmem [shape: f32[408,128], index: 1, kind: input, shape index: {}]   ;;  %s2070_s2 = inlined_call_operand.vmem [shape: f32[1,8], index: 2, kind: output, shape index: {0}]   ;;  %s2071_s3 = inlined_call_operand.hbm [shape: f32[1,1], index: 3, kind: output, shape index: {1}]  }
   0x1   :  { %v62_v0 = vld [vmem:[%s2069_s1 + $0x180] sm:$0xff]  ;;  %v63_v1 = vld [vmem:[%s2069_s1 + $0x188] sm:$0xff]  ;;  %1412 = vmatprep.subr.bf16.mxu1 %v1615_v2  ;;  %1192 = vmatprep.mubr.msk.f32.mxu1 %vm1616_vm0, %v1617_v4 }
   0x2   :  { %v1653_v3 = vpack.c.bf16 %v63_v1, %v62_v0  ;;  %v1660_v5 = vld [vmem:[%s2068_s0] sm:$0x1]  ;;  %1439 = vmatprep.subr.bf16.mxu0 %v1615_v2  ;;  %1262 = vmatprep.mubr.msk.f32.mxu0 %vm1616_vm0, %v1617_v4 }
   0x3   :  { %v77_v6 = vand.u32 2139095040, %v1660_v5  ;;  %v74_v8 = vand.u32 2147483647, %v1660_v5 }
   0x4   :  { %1414 = vmatpush3.bf16.msra.mxu1 %v1653_v3 }
   0x5   :  { %v78_v7 = vshrl.u32 %v77_v6, 23  ;;  %1415 = vmatprep.subr.bf16.mxu1 %v1615_v2  ;;  %v81_v11 = vand.u32 8388607, %v74_v8 }
   0x7   :  { %v1063_v9 = vadd.s32 4294967169, %v78_v7 }
   0x9   :  { %v84_v10 = vadd.s32 1, %v1063_v9 }
   0xa   :  { %9 = vsyncpa [#allocation3], 0  ;;  %v82_v14 = vor.u32 8388608, %v81_v11  ;;  %v1618_v17 = vmov 683565275   ;;  %vm76_vm8 = vcmp.lt.s32.totalorder %v1660_v5, 0 }
   0xb   :  { %vm85_vm1 = vcmp.gt.s32.totalorder %v84_v10, 0  ;;  %v1619_v19 = vmov 2475754826   ;;  %v1620_v21 = vmov 2131351028   ;;  %s1625_s14 = smov [#allocation2]  }
   0xc   :  { %v86_v12 = vsel %vm85_vm1, %v84_v10, 0  ;;  %v1621_v23 = vmov 2102212464   ;;  %v1622_v25 = vmov 920167782   ;;  %v122_v34 = vshll.u32 %v82_v14, 8 }
   0xd   :  { %v88_v13 = vand.u32 31, %v86_v12  ;;  %v87_v15 = vshrl.u32 %v86_v12, 5  ;;  %v1623_v32 = vmov 1326507024   ;;  %vm75_vm9 = vcmp.le.f32.partialorder %v74_v8, 0.7853982 }
   0xe   :  { %vm166_vm1 = vweird.f32 %v1660_v5  ;;  %s1053_s15 = sshll.u32 %s1625_s14, 4  ;;  %s1054_s15 = int_to_ptr.vmem [resolvable:$true] %s1053_s15 }
   0xf   :  { %v89_v16 = vsub.s32 32, %v88_v13  ;;  %v91_v18 = vshll.u32 %v1618_v17, %v88_v13  ;;  %v94_v20 = vshll.u32 %v1619_v19, %v88_v13  ;;  %v97_v22 = vshll.u32 %v1620_v21, %v88_v13  ;;  %s1591_s0 = scalar_lea.vmem %s1054_s15, 16  ;;  %s1595_s18 = scalar_lea.vmem %s1054_s15, 32 }
  0x10   :  { %v100_v24 = vshll.u32 %v1621_v23, %v88_v13  ;;  %v103_v26 = vshll.u32 %v1622_v25, %v88_v13  ;;  %vm106_vm2 = vcmp.lt.s32.totalorder %v87_v15, 1  ;;  %vm109_vm3 = vcmp.lt.s32.totalorder %v87_v15, 4  ;;  %p1592_p0 = scmp.ne.s32.totalorder %s1054_s15, %s1591_s0  ;;  %p1596_p1 = scmp.lt.s32.totalorder %s1054_s15, %s1054_s15 }
  0x11   :  { %v90_v27 = vshrl.u32 %v1618_v17, %v89_v16  ;;  %v92_v28 = vshrl.u32 %v1619_v19, %v89_v16  ;;  %v95_v29 = vshrl.u32 %v1620_v21, %v89_v16  ;;  %v98_v30 = vshrl.u32 %v1621_v23, %v89_v16  ;;  %p1597_p2 = scmp.lt.s32.totalorder %s1595_s18, %s1591_s0 }
  0x12   :  { %v101_v31 = vshrl.u32 %v1622_v25, %v89_v16  ;;  %v104_v33 = vshrl.u32 %v1623_v32, %v89_v16  ;;  %vm107_vm4 = vcmp.lt.s32.totalorder %v87_v15, 2  ;;  %vm108_vm5 = vcmp.lt.s32.totalorder %v87_v15, 3 }
  0x13   :  { %v93_v35 = vor.u32 %v92_v28, %v91_v18  ;;  %v96_v36 = vor.u32 %v95_v29, %v94_v20  ;;  %v99_v37 = vor.u32 %v98_v30, %v97_v22  ;;  %p1598_p3 = por %p1597_p2, %p1596_p1 }
  0x14   :  { %v102_v38 = vor.u32 %v101_v31, %v100_v24  ;;  %v105_v39 = vor.u32 %v104_v33, %v103_v26 }
  0x15   :  { %v110_v40 = vsel %vm106_vm2, %v90_v27, %v93_v35  ;;  %v111_v41 = vsel %vm109_vm3, %v99_v37, 2102212464  ;;  %v114_v42 = vsel %vm106_vm2, %v93_v35, %v96_v36  ;;  %v118_v43 = vsel %vm106_vm2, %v96_v36, %v99_v37  ;;  %p1599_p4 = pnand %p1598_p3, %p1592_p0 }
  0x16   :  { %v112_v44 = vsel %vm108_vm5, %v96_v36, %v111_v41  ;;  %v115_v45 = vsel %vm109_vm3, %v102_v38, 920167782  ;;  %v119_v46 = vsel %vm109_vm3, %v105_v39, 1326507024  ;;  %v71_v35 = vlaneseq }
  0x17   :  { %v116_v47 = vsel %vm108_vm5, %v99_v37, %v115_v45  ;;  %v120_v48 = vsel %vm108_vm5, %v102_v38, %v119_v46  ;;  %v113_v49 = vsel %vm107_vm4, %v110_v40, %v112_v44  ;;  %vm284_vm3 = vcmask 130048  }
  0x18   :  { %v117_v50 = vsel %vm107_vm4, %v114_v42, %v116_v47  ;;  %v121_v51 = vsel %vm107_vm4, %v118_v43, %v120_v48  ;;  %v129_v56 = vmul.u32 %v122_v34, %v113_v49  ;;  %v1697_v39 = vand.u32 127, %v71_v35  ;;  %v14_v42 = vld [vmem:[%s2069_s1] sm:$0xff]  ;;  %v15_v43 = vld [vmem:[%s2069_s1 + $0x8] sm:$0xff] }
  0x19   :  { %v1682_v52 = vmul.u32.u64.low %v122_v34, %v121_v51  ;;  %v1683_v53 = vmul.u32.u64.high %v122_v34, %v121_v51, %v1682_v52  ;;  %v1685_v54 = vmul.u32.u64.low %v122_v34, %v117_v50  ;;  %v1686_v55 = vmul.u32.u64.high %v122_v34, %v117_v50, %v1685_v54 }
  0x1a   :  { %vm73_vm2 = vcmp.lt.s32.totalorder %v1697_v39, 8  ;;  %v1707_v50 = vpack.c.bf16 %v15_v43, %v14_v42  ;;  %v64_v43 = vld [vmem:[%s2069_s1 + $0x190] sm:$0x1]  ;;  %vm573_vm5 = vcmask 1040384  }
  0x1b   :  { %vm131_vm6 = vc.u32 %v1683_v53, %v1685_v54  ;;  %v132_v57 = vadd.s32 1, %v1686_v55  ;;  %v130_v9 = vadd.s32 %v1685_v54, %v1683_v53  ;;  %v16_v53 = vld [vmem:[%s2069_s1 + $0x10] sm:$0xff] }
  0x1d   :  { %v133_v58 = vsel %vm131_vm6, %v132_v57, %v1686_v55  ;;  %v19_v57 = vld [vmem:[%s2069_s1 + $0x28] sm:$0xff] }
  0x1e   :  { %v134_v59 = vadd.s32 %v133_v58, %v129_v56  ;;  %v18_v56 = vld [vmem:[%s2069_s1 + $0x20] sm:$0xff] }
  0x1f   :  { %v1736_v58 = vpack.c.bf16 %v19_v57, %v18_v56  ;;  %v48_v56 = vld [vmem:[%s2069_s1 + $0x110] sm:$0xff] }
  0x20   :  { %v135_v60 = vadd.s32 536870912, %v134_v59 }
  0x22   :  { %v136_v61 = vshrl.u32 %v135_v60, 30  ;;  %v21_v60 = vld [vmem:[%s2069_s1 + $0x38] sm:$0xff] }
  0x24   :  { %v137_v62 = vshll.u32 %v136_v61, 30  ;;  %v160_v26 = vsub.s32 4, %v136_v61 }
  0x26   :  { %v138_v63 = vsub.s32 %v134_v59, %v137_v62  ;;  %v161_v29 = vsel %vm76_vm8, %v160_v26, %v136_v61  ;;  %v20_v59 = vld [vmem:[%s2069_s1 + $0x30] sm:$0xff]  ;;  %v22_v62 = vld [vmem:[%s2069_s1 + $0x40] sm:$0xff] }
  0x27   :  { %v163_v33 = vsel %vm75_vm9, 0, %v161_v29  ;;  %v1746_v61 = vpack.c.bf16 %v21_v60, %v20_v59  ;;  %v34_v26 = vld [vmem:[%s2069_s1 + $0xa0] sm:$0xff]  ;;  %v36_v29 = vld [vmem:[%s2069_s1 + $0xb0] sm:$0xff]  ;;  %v49_v59 = vld [vmem:[%s2069_s1 + $0x118] sm:$0xff] }
  0x28   :  { %v140_v0 = vsub.s32 0, %v138_v63  ;;  %v270_v34 = vadd.s32 3, %v163_v33  ;;  %v167_v36 = vand.u32 3, %v163_v33  ;;  %v38_v33 = vld [vmem:[%s2069_s1 + $0xc0] sm:$0xff]  ;;  %v1467_v60 = vpack.c.bf16 %v49_v59, %v48_v56 }
  0x2a   :  { %v1064_v1 = vmin.u32 %v140_v0, %v138_v63  ;;  %v271_v37 = vand.u32 3, %v270_v34  ;;  %vm172_vm10 = vcmp.eq.s32.totalorder %v167_v36, 2  ;;  %vm169_vm12 = vcmp.eq.s32.totalorder %v167_v36, 0  ;;  %v39_v34 = vld [vmem:[%s2069_s1 + $0xc8] sm:$0xff] }
  0x2b   :  { %vm168_vm14 = vcmp.lt.s32.totalorder %v167_v36, 2  ;;  %v1836_v36 = vpack.c.bf16 %v39_v34, %v38_v33 }
  0x2c   :  { %v142_v6 = vclz %v1064_v1  ;;  %vm276_vm11 = vcmp.eq.s32.totalorder %v271_v37, 2  ;;  %vm273_vm13 = vcmp.eq.s32.totalorder %v271_v37, 0  ;;  %vm272_vm15 = vcmp.lt.s32.totalorder %v271_v37, 2  ;;  %v24_v1 = vld [vmem:[%s2069_s1 + $0x50] sm:$0xff] }
  0x2d   :  { %v40_v37 = vld [vmem:[%s2069_s1 + $0xd0] sm:$0xff] }
  0x2e   :  { %v1065_v7 = vadd.s32 4294967294, %v142_v6  ;;  %v25_v6 = vld [vmem:[%s2069_s1 + $0x58] sm:$0xff] }
  0x30   :  { %vm1066_vm7 = vcmp.lt.s32.totalorder %v1065_v7, 0 }
  0x31   :  { %v145_v10 = vsel %vm1066_vm7, 0, %v1065_v7  ;;  %v1766_v7 = vpack.c.bf16 %v25_v6, %v24_v1  ;;  %v52_v6 = vld [vmem:[%s2069_s1 + $0x130] sm:$0xff] }
  0x32   :  { %v146_v11 = vsub.s32 32, %v145_v10  ;;  %v147_v12 = vshll.u32 %v138_v63, %v145_v10  ;;  %v150_v13 = vsub.s32 4294967266, %v145_v10  ;;  %v23_v63 = vld [vmem:[%s2069_s1 + $0x48] sm:$0xff] }
  0x33   :  { %v1756_v0 = vpack.c.bf16 %v23_v63, %v22_v62  ;;  %v27_v10 = vld [vmem:[%s2069_s1 + $0x68] sm:$0xff]  ;;  %v50_v62 = vld [vmem:[%s2069_s1 + $0x120] sm:$0xff] }
  0x34   :  { %v148_v14 = vshrl.u32 %v130_v9, %v146_v11  ;;  %v151_v15 = vadd.s32 127, %v150_v13  ;;  %v26_v9 = vld [vmem:[%s2069_s1 + $0x60] sm:$0xff]  ;;  %v29_v13 = vld [vmem:[%s2069_s1 + $0x78] sm:$0xff]  ;;  %v51_v63 = vld [vmem:[%s2069_s1 + $0x128] sm:$0xff] }
  0x35   :  { %v1776_v11 = vpack.c.bf16 %v27_v10, %v26_v9  ;;  %v1470_v1 = vpack.c.bf16 %v51_v63, %v50_v62  ;;  %v53_v9 = vld [vmem:[%s2069_s1 + $0x138] sm:$0xff] }
  0x36   :  { %v149_v16 = vor.u32 %v148_v14, %v147_v12  ;;  %v152_v18 = vshll.u32 %v151_v15, 23  ;;  %v28_v12 = vld [vmem:[%s2069_s1 + $0x70] sm:$0xff]  ;;  %v30_v15 = vld [vmem:[%s2069_s1 + $0x80] sm:$0xff]  ;;  %v1473_v10 = vpack.c.bf16 %v53_v9, %v52_v6 }
  0x37   :  { %v1787_v14 = vpack.c.bf16 %v29_v13, %v28_v12  ;;  %v54_v12 = vld [vmem:[%s2069_s1 + $0x140] sm:$0xff]  ;;  %v55_v13 = vld [vmem:[%s2069_s1 + $0x148] sm:$0xff] }
  0x38   :  { %v153_v20 = vor.u32 4788187, %v152_v18  ;;  %v156_v22 = vcvt.s32.f32 %v149_v16  ;;  %v31_v16 = vld [vmem:[%s2069_s1 + $0x88] sm:$0xff]  ;;  %v32_v18 = vld [vmem:[%s2069_s1 + $0x90] sm:$0xff] }
  0x3a   :  { %v154_v24 = vand.u32 2147483647, %v153_v20  ;;  %v1800_v20 = vpack.c.bf16 %v31_v16, %v30_v15  ;;  %v1476_v15 = vpack.c.bf16 %v55_v13, %v54_v12  ;;  %v56_v16 = vld [vmem:[%s2069_s1 + $0x150] sm:$0xff] }
  0x3c   :  { %v157_v27 = vmul.f32 %v156_v22, %v154_v24  ;;  %v33_v22 = vld [vmem:[%s2069_s1 + $0x98] sm:$0xff]  ;;  %1441 = vmatpush3.bf16.msra.mxu0 %v1800_v20 }
  0x3d   :  { %v1806_v24 = vpack.c.bf16 %v33_v22, %v32_v18  ;;  %1442 = vmatprep.subr.bf16.mxu0 %v1615_v2  ;;  %v57_v18 = vld [vmem:[%s2069_s1 + $0x158] sm:$0xff] }
  0x3e   :  { %v158_v28 = vxor.u32 2147483648, %v157_v27  ;;  %v1479_v22 = vpack.c.bf16 %v57_v18, %v56_v16 }
  0x40   :  { %v159_v30 = vsel %vm76_vm8, %v158_v28, %v157_v27  ;;  %v35_v27 = vld [vmem:[%s2069_s1 + $0xa8] sm:$0xff]  ;;  %1444 = vmatpush3.bf16.msra.mxu0 %v1806_v24 }
  0x41   :  { %v162_v31 = vsel %vm75_vm9, %v1660_v5, %v159_v30  ;;  %v17_v5 = vld [vmem:[%s2069_s1 + $0x18] sm:$0xff]  ;;  %v1816_v28 = vpack.c.bf16 %v35_v27, %v34_v26  ;;  %1445 = vmatprep.subr.bf16.mxu0 %v1615_v2  ;;  %v58_v26 = vld [vmem:[%s2069_s1 + $0x160] sm:$0xff]  ;;  %v59_v27 = vld [vmem:[%s2069_s1 + $0x168] sm:$0xff] }
  0x42   :  { %1581 = vcosq.f32 %v162_v31  ;;  %v1724_v55 = vpack.c.bf16 %v17_v5, %v16_v53  ;;  %v37_v30 = vld [vmem:[%s2069_s1 + $0xb8] sm:$0xff]  ;;  %v46_v5 = vld [vmem:[%s2069_s1 + $0x100] sm:$0xff] }
  0x43   :  { %1583 = vsinq.f32 %v162_v31  ;;  %v1826_v31 = vpack.c.bf16 %v37_v30, %v36_v29  ;;  %v1482_v29 = vpack.c.bf16 %v59_v27, %v58_v26  ;;  %v65_v30 = vld [vmem:[%s2069_s1 + $0x191] sm:$0x1] }
  0x44   :  { %1447 = vmatpush3.bf16.msra.mxu0 %v1816_v28 }
  0x45   :  { %1448 = vmatprep.subr.bf16.mxu0 %v1615_v2 }
  0x48   :  { %1450 = vmatpush3.bf16.msra.mxu0 %v1826_v31 }
  0x49   :  { %1451 = vmatprep.subr.bf16.mxu0 %v1615_v2 }
  0x4c   :  { %v1582_v38 = vpop.eup %1581  ;;  %1453 = vmatpush3.bf16.msra.mxu0 %v1836_v36 }
  0x4d   :  { %v1584_v40 = vpop.eup %1583  ;;  %v173_v8 = vxor.u32 2147483648, %v1582_v38  ;;  %1454 = vmatprep.subr.bf16.mxu0 %v1615_v2 }
  0x4e   :  { %v170_v41 = vxor.u32 2147483648, %v1584_v40 }
  0x4f   :  { %v174_v44 = vsel %vm172_vm10, %v173_v8, %v1584_v40  ;;  %v278_v45 = vsel %vm276_vm11, %v173_v8, %v1584_v40  ;;  %v42_v8 = vld [vmem:[%s2069_s1 + $0xe0] sm:$0xff]  ;;  %vm893_vm11 = vcmask 60416  }
  0x50   :  { %v171_v46 = vsel %vm169_vm12, %v1582_v38, %v170_v41  ;;  %v275_v47 = vsel %vm273_vm13, %v1582_v38, %v170_v41  ;;  %v41_v38 = vld [vmem:[%s2069_s1 + $0xd8] sm:$0xff]  ;;  %v43_v41 = vld [vmem:[%s2069_s1 + $0xe8] sm:$0xff]  ;;  %vm913_vm12 = vcmask 64512  }
  0x51   :  { %v175_v48 = vsel %vm168_vm14, %v171_v46, %v174_v44  ;;  %v279_v49 = vsel %vm272_vm15, %v275_v47, %v278_v45  ;;  %v1846_v40 = vpack.c.bf16 %v41_v38, %v40_v37  ;;  %v1856_v42 = vpack.c.bf16 %v43_v41, %v42_v8  ;;  %v60_v8 = vld [vmem:[%s2069_s1 + $0x170] sm:$0xff]  ;;  %v61_v41 = vld [vmem:[%s2069_s1 + $0x178] sm:$0xff] }
  0x52   :  { %v1709_v51 = vsel %vm166_vm1, nan, %v175_v48  ;;  %v1711_v52 = vsel %vm166_vm1, nan, %v279_v49  ;;  %v44_v48 = vld [vmem:[%s2069_s1 + $0xf0] sm:$0xff]  ;;  %v45_v49 = vld [vmem:[%s2069_s1 + $0xf8] sm:$0xff] }
  0x53   :  { %v281_v54 = vsel %vm73_vm2, %v1709_v51, %v1711_v52  ;;  %1456 = vmatpush3.bf16.msra.mxu0 %v1846_v40  ;;  %v1875_v53 = vpack.c.bf16 %v45_v49, %v44_v48 }
  0x54   :  { %1193 = vmatmul.mubr.msk.f32.vlgmr.msra.gmra.mrb[0].mxu1 %vm284_vm3, %v281_v54  ;;  %1457 = vmatprep.subr.bf16.mxu0 %v1615_v2  ;;  %v47_v54 = vld [vmem:[%s2069_s1 + $0x108] sm:$0xff] }
  0x55   :  { %1417 = vmatpush3.bf16.msra.mxu1 %v1707_v50  ;;  %1227 = vmatprep.mubr.msk.f32.mxu1 %vm1616_vm0, %v1617_v4  ;;  %v1464_v57 = vpack.c.bf16 %v47_v54, %v46_v5 }
  0x56   :  { %1418 = vmatprep.subr.bf16.mxu1 %v1615_v2 }
  0x57   :  { %1459 = vmatpush3.bf16.msra.mxu0 %v1856_v42 }
  0x58   :  { %1460 = vmatprep.subr.bf16.mxu0 %v1615_v2 }
  0x59   :  { %1420 = vmatpush3.bf16.msra.mxu1 %v1724_v55 }
  0x5a   :  { %1421 = vmatprep.subr.bf16.mxu1 %v1615_v2 }
  0x5b   :  { %1462 = vmatpush3.bf16.msra.mxu0 %v1875_v53 }
  0x5c   :  { %1487 = vmatprep.subr.bf16.mxu0 %v1615_v2 }
  0x5d   :  { %1423 = vmatpush3.bf16.msra.mxu1 %v1736_v58 }
  0x5e   :  { %1424 = vmatprep.subr.bf16.mxu1 %v1615_v2 }
  0x61   :  { %1426 = vmatpush3.bf16.msra.mxu1 %v1746_v61 }
  0x62   :  { %1427 = vmatprep.subr.bf16.mxu1 %v1615_v2 }
  0x65   :  { %1429 = vmatpush3.bf16.msra.mxu1 %v1756_v0 }
  0x66   :  { %1430 = vmatprep.subr.bf16.mxu1 %v1615_v2 }
  0x69   :  { %1432 = vmatpush3.bf16.msra.mxu1 %v1766_v7 }
  0x6a   :  { %1433 = vmatprep.subr.bf16.mxu1 %v1615_v2 }
  0x6d   :  { %1435 = vmatpush3.bf16.msra.mxu1 %v1776_v11 }
  0x6e   :  { %1436 = vmatprep.subr.bf16.mxu1 %v1615_v2 }
  0x71   :  { %1438 = vmatpush3.bf16.msra.mxu1 %v1787_v14 }
  0x72   :  { %1463 = vmatprep.subr.bf16.mxu1 %v1615_v2 }
 0x127   :  { %v354_v44 = vpop.f32.mrb[0].mxu1 }
 0x128   :  { %v1864_v45 = vadd.f32 %v354_v44, %v64_v43  ;;  %v1194_v46 = vpop.f32.mrb[1].mxu1  ;;  %v1485_v43 = vpack.c.bf16 %v61_v41, %v60_v8  ;;  %v66_v44 = vld [vmem:[%s2069_s1 + $0x192] sm:$0x1] }
 0x12a   :  { %v358_v47 = vmax.f32 %v1864_v45, 0.0  ;;  %vm729_vm10 = vcmp.gt.f32.partialorder %v1864_v45, 0.0 }
 0x12c   :  { %1228 = vmatmul.mubr.f32.vlgmr.msra.gmra.mrb[2].mxu1 %v358_v47 }
 0x12d   :  { %1297 = vmatprep.mubr.msk.f32.mxu1 %vm1616_vm0, %v1617_v4  ;;  %1465 = vmatpush3.bf16.msra.mxu1 %v1464_v57 }
 0x12e   :  { %1466 = vmatprep.subr.bf16.mxu1 %v1615_v2 }
 0x131   :  { %1468 = vmatpush3.bf16.msra.mxu1 %v1467_v60 }
 0x132   :  { %1469 = vmatprep.subr.bf16.mxu1 %v1615_v2 }
 0x135   :  { %1471 = vmatpush3.bf16.msra.mxu1 %v1470_v1 }
 0x136   :  { %1472 = vmatprep.subr.bf16.mxu1 %v1615_v2 }
 0x139   :  { %1474 = vmatpush3.bf16.msra.mxu1 %v1473_v10 }
 0x13a   :  { %1475 = vmatprep.subr.bf16.mxu1 %v1615_v2 }
 0x13d   :  { %1477 = vmatpush3.bf16.msra.mxu1 %v1476_v15 }
 0x13e   :  { %1478 = vmatprep.subr.bf16.mxu1 %v1615_v2 }
 0x141   :  { %1480 = vmatpush3.bf16.msra.mxu1 %v1479_v22 }
 0x142   :  { %1481 = vmatprep.subr.bf16.mxu1 %v1615_v2 }
 0x145   :  { %1483 = vmatpush3.bf16.msra.mxu1 %v1482_v29 }
 0x146   :  { %1484 = vmatprep.subr.bf16.mxu1 %v1615_v2 }
 0x149   :  { %1486 = vmatpush3.bf16.msra.mxu1 %v1485_v43 }
 0x14a   :  { %1511 = vmatprep.subr.bf16.mxu1 %v1615_v2 }
 0x1ff   :  { %v425_v33 = vpop.f32.mrb[2].mxu1 }
 0x200   :  { %v1931_v34 = vadd.f32 %v425_v33, %v65_v30  ;;  %v1229_v37 = vpop.f32.mrb[3].mxu1 }
 0x202   :  { %v429_v38 = vmax.f32 %v1931_v34, 0.0  ;;  %vm657_vm7 = vcmp.gt.f32.partialorder %v1931_v34, 0.0 }
 0x204   :  { %1263 = vmatmul.mubr.f32.vlgmr.msra.gmra.mrb[0].mxu0 %v429_v38 }
 0x205   :  { %1489 = vmatpush3.bf16.xpose.msra.mxu0 %v1464_v57  ;;  %1332 = vmatprep.mubr.msk.f32.mxu0 %vm1616_vm0, %v1617_v4  ;;  %v282_v57 = vsub.f32 0.0, %v1711_v52 }
 0x206   :  { %1490 = vmatprep.subr.bf16.mxu0 %v1615_v2 }
 0x20d   :  { %1492 = vmatpush3.bf16.xpose.msra.mxu0 %v1467_v60 }
 0x20e   :  { %1493 = vmatprep.subr.bf16.mxu0 %v1615_v2 }
 0x215   :  { %1495 = vmatpush3.bf16.xpose.msra.mxu0 %v1470_v1 }
 0x216   :  { %1496 = vmatprep.subr.bf16.mxu0 %v1615_v2 }
 0x21d   :  { %1498 = vmatpush3.bf16.xpose.msra.mxu0 %v1473_v10 }
 0x21e   :  { %1499 = vmatprep.subr.bf16.mxu0 %v1615_v2 }
 0x225   :  { %1501 = vmatpush3.bf16.xpose.msra.mxu0 %v1476_v15 }
 0x226   :  { %1502 = vmatprep.subr.bf16.mxu0 %v1615_v2 }
 0x22d   :  { %1504 = vmatpush3.bf16.xpose.msra.mxu0 %v1479_v22 }
 0x22e   :  { %1505 = vmatprep.subr.bf16.mxu0 %v1615_v2 }
 0x235   :  { %1507 = vmatpush3.bf16.xpose.msra.mxu0 %v1482_v29 }
 0x236   :  { %1508 = vmatprep.subr.bf16.mxu0 %v1615_v2 }
 0x23d   :  { %1510 = vmatpush3.bf16.xpose.msra.mxu0 %v1485_v43 }
 0x23e   :  { %1535 = vmatprep.subr.bf16.mxu0 %v1615_v2 }
 0x2d7   :  { %v496_v46 = vpop.f32.mrb[0].mxu0 }
 0x2d8   :  { %v497_v47 = vadd.f32 %v496_v46, %v66_v44  ;;  %v1264_v48 = vpop.f32.mrb[1].mxu0 }
 0x2da   :  { %v500_v49 = vmax.f32 %v497_v47, 0.0  ;;  %vm585_vm6 = vcmp.gt.f32.partialorder %v497_v47, 0.0 }
 0x2dc   :  { %1298 = vmatmul.mubr.f32.vlgmr.msra.gmra.mrb[4].mxu1 %v500_v49 }
 0x2dd   :  { %1513 = vmatpush3.bf16.xpose.msra.mxu1 %v1800_v20  ;;  %1367 = vmatprep.mubr.msk.f32.mxu1 %vm1616_vm0, %v1617_v4  ;;  %v67_v20 = vld [vmem:[%s2069_s1 + $0x193] sm:$0x1] }
 0x2de   :  { %1514 = vmatprep.subr.bf16.mxu1 %v1615_v2 }
 0x2e5   :  { %1516 = vmatpush3.bf16.xpose.msra.mxu1 %v1806_v24 }
 0x2e6   :  { %1517 = vmatprep.subr.bf16.mxu1 %v1615_v2 }
 0x2ed   :  { %1519 = vmatpush3.bf16.xpose.msra.mxu1 %v1816_v28 }
 0x2ee   :  { %1520 = vmatprep.subr.bf16.mxu1 %v1615_v2 }
 0x2f5   :  { %1522 = vmatpush3.bf16.xpose.msra.mxu1 %v1826_v31 }
 0x2f6   :  { %1523 = vmatprep.subr.bf16.mxu1 %v1615_v2 }
 0x2fd   :  { %1525 = vmatpush3.bf16.xpose.msra.mxu1 %v1836_v36  ;;  %v68_v36 = vld [vmem:[%s2069_s1 + $0x194] sm:$0x1] }
 0x2fe   :  { %1526 = vmatprep.subr.bf16.mxu1 %v1615_v2 }
 0x305   :  { %1528 = vmatpush3.bf16.xpose.msra.mxu1 %v1846_v40 }
 0x306   :  { %1529 = vmatprep.subr.bf16.mxu1 %v1615_v2 }
 0x30d   :  { %1531 = vmatpush3.bf16.xpose.msra.mxu1 %v1856_v42 }
 0x30e   :  { %1532 = vmatprep.subr.bf16.mxu1 %v1615_v2 }
 0x315   :  { %1534 = vmatpush3.bf16.xpose.msra.mxu1 %v1875_v53  ;;  %v69_v53 = vld [vmem:[%s2069_s1 + $0x195] sm:$0x1]  ;;  %s1624_s1 = smov 120  }
 0x316   :  { %1559 = vmatprep.subr.bf16.mxu1 %v1615_v2  ;;  %v577_v54 = vsel %vm573_vm5, %v69_v53, 0.0 }
 0x3af   :  { %v567_v24 = vpop.f32.mrb[4].mxu1 }
 0x3b0   :  { %v568_v28 = vadd.f32 %v567_v24, %v67_v20  ;;  %v1299_v31 = vpop.f32.mrb[5].mxu1 }
 0x3b2   :  { %v571_v40 = vmax.f32 %v568_v28, 0.0  ;;  %vm583_vm4 = vcmp.gt.f32.partialorder %v568_v28, 0.0 }
 0x3b3   :  { %1333 = vmatmul.mubr.msk.f32.vlgmr.msra.gmra.mrb[2].mxu0 %vm583_vm4, %v68_v36 }
 0x3b4   :  { %v572_v42 = vmul.f32 %v571_v40, %v68_v36  ;;  %1537 = vmatpush3.bf16.xpose.msra.mxu0 %v1707_v50  ;;  %1402 = vmatprep.mubr.msk.f32.mxu0 %vm1616_vm0, %v1617_v4 }
 0x3b5   :  { %1538 = vmatprep.subr.bf16.mxu0 %v1615_v2 }
 0x3b6   :  { %v574_v5 = vsel %vm573_vm5, %v572_v42, 0.0 }
 0x3b7   :  { %575 = vadd.xlane.f32.xlu1 %v574_v5 }
 0x3bb   :  { %578 = vadd.xlane.f32.xlu1 %v577_v54 }
 0x3bc   :  { %1540 = vmatpush3.bf16.xpose.msra.mxu0 %v1724_v55 }
 0x3bd   :  { %1541 = vmatprep.subr.bf16.mxu0 %v1615_v2 }
 0x3c4   :  { %1543 = vmatpush3.bf16.xpose.msra.mxu0 %v1736_v58 }
 0x3c5   :  { %1544 = vmatprep.subr.bf16.mxu0 %v1615_v2 }
 0x3cc   :  { %1546 = vmatpush3.bf16.xpose.msra.mxu0 %v1746_v61 }
 0x3cd   :  { %1547 = vmatprep.subr.bf16.mxu0 %v1615_v2 }
 0x3d4   :  { %1549 = vmatpush3.bf16.xpose.msra.mxu0 %v1756_v0  ;;  %v802_v0 = vshrl.u32 %v71_v35, 7  ;;  %v283_v35 = vsel %vm73_vm2, %v282_v57, %v1709_v51 }
 0x3d5   :  { %1550 = vmatprep.subr.bf16.mxu0 %v1615_v2 }
 0x3dc   :  { %1552 = vmatpush3.bf16.xpose.msra.mxu0 %v1766_v7  ;;  %v803_v7 = vmul.u32 32, %v802_v0 }
 0x3dd   :  { %1553 = vmatprep.subr.bf16.mxu0 %v1615_v2 }
 0x3de   :  { %vm804_vm8 = vcmp.ge.s32.totalorder %v1697_v39, %v803_v7 }
 0x3e4   :  { %1555 = vmatpush3.bf16.xpose.msra.mxu0 %v1776_v11  ;;  %v810_v11 = vsub.s32 0, %v802_v0 }
 0x3e5   :  { %1556 = vmatprep.subr.bf16.mxu0 %v1615_v2  ;;  %v805_v2 = vadd.s32 32, %v803_v7 }
 0x3e6   :  { %v886_v59 = vrot.slane %v283_v35, %v810_v11 }
 0x3e7   :  { %vm806_vm9 = vcmp.lt.s32.totalorder %v1697_v39, %v805_v2 }
 0x3ec   :  { %1558 = vmatpush3.bf16.xpose.msra.mxu0 %v1787_v14 }
 0x486   :  { %v652_v50 = vpop.f32.mrb[2].mxu0 }
 0x487   :  { %v1334_v55 = vpop.f32.mrb[3].mxu0  ;;  %1368 = vmatmul.mubr.msk.f32.vlgmr.msra.gmra.mrb[6].mxu1 %vm585_vm6, %v652_v50 }
 0x488   :  { %1561 = vmatpush3.bf16.xpose.msra.mxu1 %v1653_v3  ;;  %1409 = vmatprep.mubr.msk.f32.mxu1 %vm1616_vm0, %v1617_v4  ;;  %vm807_vm0 = vmand %vm804_vm8, %vm806_vm9 }
 0x55a   :  { %v724_v58 = vpop.f32.mrb[6].mxu1 }
 0x55b   :  { %v1369_v61 = vpop.f32.mrb[7].mxu1  ;;  %1403 = vmatmul.mubr.msk.f32.vlgmr.msra.gmra.mrb[4].mxu0 %vm657_vm7, %v724_v58 }
 0x62e   :  { %v796_v3 = vpop.f32.mrb[4].mxu0 }
 0x62f   :  { %v800_v14 = vsel %vm729_vm10, %v796_v3, 0.0  ;;  %v1404_v56 = vpop.f32.mrb[5].mxu0 }
 0x630   :  { %v811_v4 = vrot.slane %v800_v14, %v810_v11 }
 0x632   :  { %1410 = vmatmul.mubr.msk.f32.vlgmr.msra.gmra.mrb[8].mxu1 %vm807_vm0, %v811_v4 }
 0x705   :  { %v879_v60 = vpop.f32.mrb[8].mxu1 }
 0x706   :  { %v887_v62 = vmul.f32 %v886_v59, %v879_v60  ;;  %v1411_v63 = vpop.f32.mrb[9].mxu1 }
 0x708   :  { %889 = vrot.lane.b32.xlu0 %v887_v62, %s1624_s1 }
 0x77a   :  { %v890_v45 = vpop.permute.xlu0 %889 }
 0x77b   :  { %v892_v1 = vadd.f32 %v890_v45, %v887_v62 }
 0x77d   :  { %v894_v6 = vsel %vm893_vm11, %v892_v1, 0.0 }
 0x77e   :  { %v895_v9 = vrot.slane %v894_v6, 4 }
 0x780   :  { %v896_v10 = vadd.f32 %v895_v9, %v894_v6 }
 0x782   :  { %v897_v12 = vrot.slane %v896_v10, 2 }
 0x784   :  { %v898_v13 = vadd.f32 %v897_v12, %v896_v10 }
 0x786   :  { %v899_v15 = vrot.slane %v898_v13, 1 }
 0x788   :  { %v900_v52 = vadd.f32 %v899_v15, %v898_v13 }
 0x78a   :  { %v2010_v16 = vmul.f32 0.25, %v900_v52 }
 0x78c   :  { %v902_v39 = vsub.f32 %v892_v1, %v2010_v16 }
 0x78e   :  { %v903_v51 = vmul.f32 %v902_v39, %v902_v39 }
 0x790   :  { %v904_v18 = vsel %vm893_vm11, %v903_v51, 0.0 }
 0x791   :  { %v905_v22 = vrot.slane %v904_v18, 4 }
 0x793   :  { %v906_v26 = vadd.f32 %v905_v22, %v904_v18 }
 0x795   :  { %v907_v27 = vrot.slane %v906_v26, 2 }
 0x797   :  { %v908_v29 = vadd.f32 %v907_v27, %v906_v26 }
 0x799   :  { %v909_v30 = vrot.slane %v908_v29, 1 }
 0x79b   :  { %v910_v33 = vadd.f32 %v909_v30, %v908_v29 }
 0x79d   :  { %v912_v34 = vmul.f32 0.33333334, %v910_v33 }
 0x79f   :  { %v914_v37 = vsel %vm913_vm12, %v912_v34, 0.0 }
 0x7a0   :  { %915 = vadd.xlane.f32.xlu0 %v914_v37 }
 0x82d   :  { %v916_v38 = vpop.xlane.xlu0 %915 }
 0x82e   :  { %v918_v8 = vmul.f32 0.125, %v916_v38 }
 0x830   :  { %1585 = vrsqrt.f32 %v918_v8  ;;  %vm921_vm13 = vcmp.eq.f32.partialorder %v918_v8, inf  ;;  %v924_v44 = vand.u32 2147483648, %v918_v8  ;;  %vm923_vm14 = vcmp.eq.f32.partialorder %v918_v8, 0.0 }
 0x83a   :  { %v1586_v41 = vpop.eup %1585 }
 0x83b   :  { %v920_v43 = vmul.f32 %v1586_v41, %v918_v8 }
 0x83d   :  { %v922_v46 = vsel %vm921_vm13, %v918_v8, %v920_v43 }
 0x83e   :  { %v2013_v47 = vsel %vm923_vm14, %v924_v44, %v922_v46  ;;  %vm1040_vm14 = vcmask 57344  }
 0x83f   :  { %v926_v48 = vsub.f32 3.0, %v2013_v47 }
 0x841   :  { %v927_v49 = vsub.f32 1.0, %v926_v48 }
 0x843   :  { %v2018_v20 = vmul.f32 3.1415927, %v927_v49 }
 0x845   :  { %v932_v24 = vand.u32 2139095040, %v2018_v20  ;;  %v929_v40 = vand.u32 2147483647, %v2018_v20  ;;  %vm931_vm7 = vcmp.lt.s32.totalorder %v2018_v20, 0  ;;  %vm1021_vm11 = vweird.f32 %v2018_v20 }
 0x847   :  { %v933_v28 = vshrl.u32 %v932_v24, 23  ;;  %v936_v5 = vand.u32 8388607, %v929_v40  ;;  %vm930_vm8 = vcmp.le.f32.partialorder %v929_v40, 0.7853982 }
 0x849   :  { %v1076_v31 = vadd.s32 4294967169, %v933_v28  ;;  %v937_v4 = vor.u32 8388608, %v936_v5 }
 0x84b   :  { %v939_v36 = vadd.s32 1, %v1076_v31 }
 0x84d   :  { %vm940_vm15 = vcmp.gt.s32.totalorder %v939_v36, 0 }
 0x84e   :  { %v941_v42 = vsel %vm940_vm15, %v939_v36, 0  ;;  %vm1043_vm15 = vcmask 0  }
 0x84f   :  { %v943_v53 = vand.u32 31, %v941_v42  ;;  %v942_v50 = vshrl.u32 %v941_v42, 5 }
 0x851   :  { %v944_v54 = vsub.s32 32, %v943_v53  ;;  %v946_v55 = vshll.u32 %v1618_v17, %v943_v53  ;;  %v949_v58 = vshll.u32 %v1619_v19, %v943_v53  ;;  %v952_v7 = vshll.u32 %v1620_v21, %v943_v53 }
 0x852   :  { %v955_v11 = vshll.u32 %v1621_v23, %v943_v53  ;;  %v958_v14 = vshll.u32 %v1622_v25, %v943_v53  ;;  %vm961_vm1 = vcmp.lt.s32.totalorder %v942_v50, 1  ;;  %vm964_vm2 = vcmp.lt.s32.totalorder %v942_v50, 4 }
 0x853   :  { %v947_v61 = vshrl.u32 %v1619_v19, %v944_v54  ;;  %v950_v0 = vshrl.u32 %v1620_v21, %v944_v54  ;;  %v953_v2 = vshrl.u32 %v1621_v23, %v944_v54  ;;  %v956_v3 = vshrl.u32 %v1622_v25, %v944_v54 }
 0x854   :  { %v959_v56 = vshrl.u32 %v1623_v32, %v944_v54  ;;  %v945_v45 = vshrl.u32 %v1618_v17, %v944_v54  ;;  %vm963_vm3 = vcmp.lt.s32.totalorder %v942_v50, 3  ;;  %vm962_vm4 = vcmp.lt.s32.totalorder %v942_v50, 2 }
 0x855   :  { %v948_v57 = vor.u32 %v947_v61, %v946_v55  ;;  %v951_v35 = vor.u32 %v950_v0, %v949_v58  ;;  %v954_v59 = vor.u32 %v953_v2, %v952_v7  ;;  %v957_v60 = vor.u32 %v956_v3, %v955_v11  ;;  %v576_v11 = vpop.xlane.xlu1 %575 }
 0x856   :  { %v960_v19 = vor.u32 %v959_v56, %v958_v14  ;;  %v977_v32 = vshll.u32 %v937_v4, 8 }
 0x857   :  { %v966_v62 = vsel %vm964_vm2, %v954_v59, 2102212464  ;;  %v969_v21 = vsel %vm961_vm1, %v948_v57, %v951_v35  ;;  %v973_v63 = vsel %vm961_vm1, %v951_v35, %v954_v59  ;;  %v970_v23 = vsel %vm964_vm2, %v957_v60, 920167782 }
 0x858   :  { %v974_v1 = vsel %vm964_vm2, %v960_v19, 1326507024  ;;  %v971_v25 = vsel %vm963_vm3, %v954_v59, %v970_v23  ;;  %v965_v9 = vsel %vm961_vm1, %v945_v45, %v948_v57  ;;  %v967_v10 = vsel %vm963_vm3, %v951_v35, %v966_v62 }
 0x859   :  { %v975_v6 = vsel %vm963_vm3, %v957_v60, %v974_v1  ;;  %v972_v12 = vsel %vm962_vm4, %v969_v21, %v971_v25  ;;  %v968_v18 = vsel %vm962_vm4, %v965_v9, %v967_v10  ;;  %v579_v59 = vpop.xlane.xlu1 %578  ;;  %v1034_v62 = vfloor.f32 %v926_v48 }
 0x85a   :  { %v976_v13 = vsel %vm962_vm4, %v973_v63, %v975_v6  ;;  %v2038_v39 = vmul.u32.u64.low %v977_v32, %v972_v12  ;;  %v2039_v51 = vmul.u32.u64.high %v977_v32, %v972_v12, %v2038_v39  ;;  %v984_v22 = vmul.u32 %v977_v32, %v968_v18 }
 0x85b   :  { %v2035_v15 = vmul.u32.u64.low %v977_v32, %v976_v13  ;;  %v2036_v52 = vmul.u32.u64.high %v977_v32, %v976_v13, %v2035_v15  ;;  %v580_v21 = vadd.f32 %v579_v59, %v576_v11  ;;  %vm1036_vm12 = vcmp.lt.f32.partialorder %v1034_v62, 0.0 }
 0x85c   :  { %v987_v17 = vadd.s32 1, %v2039_v51  ;;  %vm1035_vm13 = vcmp.gt.f32.partialorder %v1034_v62, 0.0 }
 0x85d   :  { %vm986_vm5 = vc.u32 %v2036_v52, %v2038_v39  ;;  %v985_v44 = vadd.s32 %v2038_v39, %v2036_v52  ;;  %v582_v23 = vmul.f32 0.25, %v580_v21 }
 0x85e   :  { %v988_v26 = vsel %vm986_vm5, %v987_v17, %v2039_v51 }
 0x85f   :  { %v989_v27 = vadd.s32 %v988_v26, %v984_v22 }
 0x861   :  { %v990_v29 = vadd.s32 536870912, %v989_v27 }
 0x863   :  { %v991_v30 = vshrl.u32 %v990_v29, 30 }
 0x865   :  { %v992_v33 = vshll.u32 %v991_v30, 30  ;;  %v1015_v61 = vsub.s32 4, %v991_v30 }
 0x867   :  { %v993_v34 = vsub.s32 %v989_v27, %v992_v33  ;;  %v1016_v7 = vsel %vm931_vm7, %v1015_v61, %v991_v30 }
 0x868   :  { %v1018_v2 = vsel %vm930_vm8, 0, %v1016_v7 }
 0x869   :  { %v995_v37 = vsub.s32 0, %v993_v34  ;;  %v1022_v3 = vand.u32 3, %v1018_v2 }
 0x86b   :  { %v1077_v38 = vmin.u32 %v995_v37, %v993_v34  ;;  %vm1027_vm9 = vcmp.eq.s32.totalorder %v1022_v3, 2  ;;  %vm1024_vm10 = vcmp.eq.s32.totalorder %v1022_v3, 0  ;;  %vm1023_vm0 = vcmp.lt.s32.totalorder %v1022_v3, 2 }
 0x86d   :  { %v997_v8 = vclz %v1077_v38 }
 0x86f   :  { %v1078_v41 = vadd.s32 4294967294, %v997_v8 }
 0x871   :  { %vm1079_vm6 = vcmp.lt.s32.totalorder %v1078_v41, 0 }
 0x872   :  { %v1000_v43 = vsel %vm1079_vm6, 0, %v1078_v41 }
 0x873   :  { %v1001_v46 = vsub.s32 32, %v1000_v43  ;;  %v1005_v49 = vsub.s32 4294967266, %v1000_v43  ;;  %v1002_v24 = vshll.u32 %v993_v34, %v1000_v43 }
 0x875   :  { %v1003_v28 = vshrl.u32 %v985_v44, %v1001_v46  ;;  %v1006_v31 = vadd.s32 127, %v1005_v49 }
 0x877   :  { %v1004_v36 = vor.u32 %v1003_v28, %v1002_v24  ;;  %v1007_v42 = vshll.u32 %v1006_v31, 23 }
 0x879   :  { %v1008_v53 = vor.u32 4788187, %v1007_v42  ;;  %v1011_v54 = vcvt.s32.f32 %v1004_v36 }
 0x87b   :  { %v1009_v5 = vand.u32 2147483647, %v1008_v53 }
 0x87d   :  { %v1012_v50 = vmul.f32 %v1011_v54, %v1009_v5 }
 0x87f   :  { %v1013_v55 = vxor.u32 2147483648, %v1012_v50 }
 0x881   :  { %v1014_v58 = vsel %vm931_vm7, %v1013_v55, %v1012_v50 }
 0x882   :  { %v1017_v0 = vsel %vm930_vm8, %v2018_v20, %v1014_v58 }
 0x883   :  { %1587 = vcosq.f32 %v1017_v0 }
 0x884   :  { %1589 = vsinq.f32 %v1017_v0 }
 0x88d   :  { %v1588_v14 = vpop.eup %1587 }
 0x88e   :  { %v1590_v56 = vpop.eup %1589  ;;  %v1028_v4 = vxor.u32 2147483648, %v1588_v14 }
 0x88f   :  { %v1025_v57 = vxor.u32 2147483648, %v1590_v56 }
 0x890   :  { %v1029_v35 = vsel %vm1027_vm9, %v1028_v4, %v1590_v56 }
 0x891   :  { %v1026_v40 = vsel %vm1024_vm10, %v1588_v14, %v1025_v57 }
 0x892   :  { %v1030_v60 = vsel %vm1023_vm0, %v1026_v40, %v1029_v35 }
 0x893   :  { %v1031_v19 = vsel %vm1021_vm11, nan, %v1030_v60 }
 0x894   :  { %v1032_v63 = vadd.f32 1.0, %v1031_v19 }
 0x896   :  { %v1033_v45 = vmul.f32 0.5, %v1032_v63 }
 0x898   :  { %v1037_v1 = vsel %vm1036_vm12, 0.0, %v1033_v45 }
 0x899   :  { %v1038_v25 = vsel %vm1035_vm13, 1.0, %v1037_v1 }
 0x89a   :  { %v1039_v6 = vmul.f32 %v1038_v25, %v2010_v16  ;;  %v1042_v20 = vmul.f32 %v1038_v25, %v582_v23 }
 0x89c   :  { %1041 = vst.msk [vmem:[%s2070_s2] sm:$0x1] %vm1040_vm14, %v1039_v6 }
 0x89d   :  { %1044 = vst.msk [vmem:[#allocation2] sm:$0x1] %vm1043_vm15, %v1042_v20 }
 0x89e   :  { %1602 = shalt.err (!%p1599_p4)
}
 0x89f   :  { %s1603_s21 = scalar_lea.hbm %s2071_s3, 16 }
 0x8a0   :  { %p1604_p5 = scmp.ne.s32.totalorder %s2071_s3, %s1603_s21  ;;  %p1607_p6 = scmp.lt.u32.totalorder %s1603_s21, %s2071_s3 }
 0x8a2   :  { %p1609_p7 = pnand %p1607_p6, %p1604_p5 }
 0x8a4   :  { %1612 = shalt.err (!%p1609_p7)
}
 0x8a5   :  { %1056 = dma.vmem_to_hbm [thread:$0]  %s1054_s15, 16, %s2071_s3, [#allocation3]  }
 0x8a6   :  { %1613 = dma.done.wait [#allocation3], 16  }
 0x8a7   :  { %1614 = vsyncadd [#allocation3], 4294967280 }
 0x8a8   :  { %1062 = vsyncpa [#allocation3], 1 }

</bundles_post_ra>
